<compile_context>
chip_gen: v7x
topology: tpu7x:2x2x1
jax: 0.10.0
libtpu: 0.0.40
codegen_flags: <defaults>
</compile_context>

<pallas_src>
import math

import jax
import jax.numpy as jnp
from jax.experimental import pallas as pl
from jax.experimental.pallas import tpu as pltpu

_LANE = 128
_TARGET_BLOCK_BYTES = 1 << 20  # ~1 MiB x-block; in+out double-buffered ~4 MiB VMEM


def _drop_path_kernel(scale_ref, x_ref, o_ref):
    # scale_ref: (tile_b, 1) float32, 0.0 or 1/keep_prob per sample.
    # x_ref / o_ref: (tile_b, tile_f) activation tile.  Compute in f32, cast on store.
    o_ref[...] = (x_ref[...].astype(jnp.float32) * scale_ref[...]).astype(o_ref.dtype)


def _sublane_multiple(itemsize):
    return {4: 8, 2: 16, 1: 32}.get(itemsize, 8)


def _choose_tiles(batch, feat, itemsize):
    """Pick (tile_b, tile_f, feat_pad): lane-dense ~1 MiB blocks, minimal padding."""
    sub = _sublane_multiple(itemsize)
    tile_b = sub if batch % sub == 0 else batch  # full batch dim is always legal

    n_lanes = -(-feat // _LANE)  # feature lanes after padding feat to a 128 multiple
    max_lanes = max(4, (_TARGET_BLOCK_BYTES // (tile_b * itemsize)) // _LANE)

    if n_lanes <= max_lanes:
        tile_f = n_lanes * _LANE
        feat_pad = tile_f
        return tile_b, tile_f, feat_pad

    # Prefer an exact divisor of n_lanes (no extra padding), >= 512 lanes wide.
    tile_f = 0
    for d in range(max_lanes, 3, -1):
        if n_lanes % d == 0:
            tile_f = d * _LANE
            break
    if tile_f == 0:
        tile_f = max_lanes * _LANE  # fall back: pad feature axis up to tile multiple
    feat_pad = (-(-feat // tile_f)) * tile_f
    return tile_b, tile_f, feat_pad


def drop_path(x, drop_prob, key, training=True):
    """DropPath forward. x: (B, ...). Returns array of same shape/dtype."""
    if (not training) or (drop_prob is None) or float(drop_prob) == 0.0:
        return x

    keep_prob = 1.0 - float(drop_prob)
    B = x.shape[0]
    feat = math.prod(x.shape[1:])
    itemsize = jnp.dtype(x.dtype).itemsize

    # Per-sample scale, computed once in float32 (matches torch.floor(keep_prob + rand)
    # while avoiding bf16 rounding of the sum near 1.0).
    rand = jax.random.uniform(key, (B,), dtype=jnp.float32)
    scale2d = (jnp.floor(keep_prob + rand) * (1.0 / keep_prob)).reshape(B, 1)

    tile_b, tile_f, feat_pad = _choose_tiles(B, feat, itemsize)

    x2d = x.reshape(B, feat)
    if feat_pad != feat:
        x2d = jnp.pad(x2d, ((0, 0), (0, feat_pad - feat)))

    grid = (B // tile_b, feat_pad // tile_f)

    out2d = pl.pallas_call(
        _drop_path_kernel,
        out_shape=jax.ShapeDtypeStruct((B, feat_pad), x.dtype),
        grid=grid,
        in_specs=[
            pl.BlockSpec((tile_b, 1), lambda i, j: (i, 0)),       # per-sample scale
            pl.BlockSpec((tile_b, tile_f), lambda i, j: (i, j)),  # activation tile
        ],
        out_specs=pl.BlockSpec((tile_b, tile_f), lambda i, j: (i, j)),
        input_output_aliases={1: 0},  # elementwise; reuse x's (padded) HBM buffer
        compiler_params=pltpu.CompilerParams(
            dimension_semantics=("parallel", "parallel")),
    )(scale2d, x2d)

    if feat_pad != feat:
        out2d = out2d[:, :feat]
    return out2d.reshape(x.shape)


if __name__ == "__main__":
    key = jax.random.PRNGKey(0)
    k_x, k_mask, k_x2 = jax.random.split(key, 3)

    B, C, H, W = 2, 4, 16, 16
    drop_prob = 0.2
    keep_prob = 1.0 - drop_prob

    x = jax.random.normal(k_x, (B, C, H, W), dtype=jnp.float32)

    # Training path: kernel executes the mask + scale hot path.
    out = jax.block_until_ready(drop_path(x, drop_prob, k_mask, training=True))
    assert out.shape == x.shape and out.dtype == x.dtype

    rand = jax.random.uniform(k_mask, (B,), dtype=jnp.float32)
    mask = jnp.floor(keep_prob + rand).reshape(B, 1, 1, 1)
    ref = x / keep_prob * mask
    assert jnp.allclose(out, ref, atol=1e-5, rtol=1e-5), "f32 mismatch"

    # Non-128-multiple feature size exercises the lane-padding path.
    x_odd = jax.random.normal(k_x2, (2, 3, 7, 7), dtype=jnp.float32)
    out_odd = jax.block_until_ready(drop_path(x_odd, drop_prob, k_mask, training=True))
    rand_o = jax.random.uniform(k_mask, (2,), dtype=jnp.float32)
    mask_o = jnp.floor(keep_prob + rand_o).reshape(2, 1, 1, 1)
    ref_odd = x_odd / keep_prob * mask_o
    assert jnp.allclose(out_odd, ref_odd, atol=1e-5, rtol=1e-5), "padded-feat mismatch"

    # bf16 path: mask/scale and multiply stay in float32, cast back on store.
    x_bf16 = jax.random.normal(k_x, (4, 8, 8, 4), dtype=jnp.bfloat16)
    out_bf16 = jax.block_until_ready(drop_path(x_bf16, drop_prob, k_mask, training=True))
    rand_b = jax.random.uniform(k_mask, (4,), dtype=jnp.float32)
    mask_b = jnp.floor(keep_prob + rand_b).reshape(4, 1, 1, 1)
    ref_bf16 = (x_bf16.astype(jnp.float32) / keep_prob * mask_b).astype(jnp.bfloat16)
    assert jnp.allclose(out_bf16.astype(jnp.float32), ref_bf16.astype(jnp.float32),
                        atol=2e-2, rtol=2e-2), "bf16 mismatch"

    # Eval path: identity.
    out_eval = jax.block_until_ready(drop_path(x, drop_prob, k_mask, training=False))
    assert jnp.array_equal(out_eval, x)

    print("KERNEL_OK")
</pallas_src>

<mosaic_0001>
module attributes {stable_mosaic.version = 11 : i64} {
  func.func @_drop_path_kernel(%arg0: i32, %arg1: i32, %arg2: memref<2x1xf32, #tpu.memory_space<vmem>>, %arg3: memref<2x1024xf32, #tpu.memory_space<vmem>>, %arg4: memref<2x1024xf32, #tpu.memory_space<vmem>>) attributes {dimension_semantics = [#tpu.dimension_semantics<parallel>, #tpu.dimension_semantics<parallel>], iteration_bounds = array<i64: 1, 1>, scalar_prefetch = 0 : i64, scratch_operands = 0 : i64, tpu.core_type = #tpu.core_type<tc>, window_params = [{transform_indices = @transform_0, window_bounds = array<i64: 2, 1>}, {transform_indices = @transform_1, window_bounds = array<i64: 2, 1024>}, {transform_indices = @transform_2, window_bounds = array<i64: 2, 1024>}]} {
    %c0 = arith.constant 0 : index
    %c0_0 = arith.constant 0 : index
    %0 = vector.load %arg3[%c0, %c0_0] : memref<2x1024xf32, #tpu.memory_space<vmem>>, vector<2x1024xf32>
    %c0_1 = arith.constant 0 : index
    %c0_2 = arith.constant 0 : index
    %1 = vector.load %arg2[%c0_1, %c0_2] : memref<2x1xf32, #tpu.memory_space<vmem>>, vector<2x1xf32>
    %2 = vector.broadcast %1 : vector<2x1xf32> to vector<2x1024xf32>
    %3 = arith.mulf %0, %2 : vector<2x1024xf32>
    %c0_3 = arith.constant 0 : index
    %c0_4 = arith.constant 0 : index
    %4 = vector.load %arg4[%c0_3, %c0_4] : memref<2x1024xf32, #tpu.memory_space<vmem>>, vector<2x1024xf32>
    tpu.vector_store %arg4[%c0_3, %c0_4], %3 {strides = array<i32>} : memref<2x1024xf32, #tpu.memory_space<vmem>>, vector<2x1024xf32>,
    return
  }
  func.func @transform_0(%arg0: i32, %arg1: i32) -> (i32, i32) {
    %c0_i32 = arith.constant 0 : i32
    %c0_i32_0 = arith.constant 0 : i32
    return %arg0, %c0_i32 : i32, i32
  }
  func.func @transform_1(%arg0: i32, %arg1: i32) -> (i32, i32) {
    %c0_i32 = arith.constant 0 : i32
    return %arg0, %arg1 : i32, i32
  }
  func.func @transform_2(%arg0: i32, %arg1: i32) -> (i32, i32) {
    %c0_i32 = arith.constant 0 : i32
    return %arg0, %arg1 : i32, i32
  }
}

</mosaic_0001>

<bundles_post_ra>
// kernel: tpu_custom_call.1
= control target key start
LH: loop header
LB: loop body
LE: loop exit
PB: predicated region body
PF: predicated region fallthrough
CT: control target
= control target key end

     0   :  { %7 = vsyncpa [#allocation3], 0  ;;  %s157_s0 = inlined_call_operand.vmem [shape: f32[2,1], index: 0, kind: input, shape index: {}]   ;;  %s158_s1 = inlined_call_operand.hbm [shape: f32[2,1024], index: 1, kind: input, shape index: {}, may-alias: {1,2}]   ;;  %s159_s2 = inlined_call_operand.hbm [shape: f32[2,1024], index: 2, kind: output, shape index: {}, may-alias: {1,2}]  }
   0x1   :  { %8 = vsyncpa [#allocation4], 0  ;;  %s111_s9 = smov [#allocation2]   ;;  %s63_s13 = scalar_lea.hbm %s158_s1, 256 }
   0x2   :  { %s17_s10 = sshll.u32 %s111_s9, 4  ;;  %p64_p0 = scmp.ne.s32.totalorder %s158_s1, %s63_s13  ;;  %s18_s10 = int_to_ptr.vmem [resolvable:$true] %s17_s10 }
   0x3   :  { %p67_p1 = scmp.lt.u32.totalorder %s63_s13, %s158_s1 }
   0x5   :  { %p69_p2 = pnand %p67_p1, %p64_p0 }
   0x7   :  { %72 = shalt.err (!%p69_p2)
}
   0x8   :  { %s73_s18 = scalar_lea.vmem %s18_s10, 256  ;;  %p78_p4 = scmp.lt.s32.totalorder %s18_s10, %s18_s10 }
   0x9   :  { %p74_p3 = scmp.ne.s32.totalorder %s18_s10, %s73_s18  ;;  %p79_p5 = scmp.lt.s32.totalorder %s73_s18, %s73_s18 }
   0xb   :  { %p80_p6 = por %p79_p5, %p78_p4 }
   0xd   :  { %p81_p7 = pnand %p80_p6, %p74_p3 }
   0xf   :  { %84 = shalt.err (!%p81_p7)
}
  0x10   :  { %20 = dma.hbm_to_vmem [thread:$0]  %s158_s1, 256, %s18_s10, [#allocation3]  }
  0x11   :  { %107 = dma.done.wait [#allocation3], 256  }
  0x12   :  { %108 = vsyncadd [#allocation3], 4294967040  ;;  %v112_v0 = vmov 0   ;;  %v26_v1 = vld [vmem:[%s157_s0] sm:$0x3]  ;;  %v34_v4 = vlaneseq  ;;  %v25_v10 = vld [vmem:[#allocation2 + $0x8] sm:$0xff] }
  0x13   :  { %62 = vset.pattern.permute.xlu0 %v112_v0  ;;  %v113_v2 = vmov 269488144   ;;  %v24_v9 = vld [vmem:[#allocation2] sm:$0xff]  ;;  %s114_s23 = smov [#allocation5]  }
  0x14   :  { %29 = vperm.xlu0 %62, %v26_v1   ;;  %v32_v3 = vunpack.c.l.s4 %v113_v2  ;;  %v35_v6 = vshrl.u32 %v34_v4, 7  ;;  %s49_s1 = sshll.u32 %s114_s23, 4  ;;  %s50_s1 = int_to_ptr.vmem [resolvable:$true] %s49_s1 }
  0x15   :  { %s85_s24 = scalar_lea.vmem %s50_s1, 256  ;;  %p90_p9 = scmp.lt.s32.totalorder %s50_s1, %s50_s1 }
  0x16   :  { %v33_v5 = vunpack.c.0.s8 %v32_v3  ;;  %p86_p8 = scmp.ne.s32.totalorder %s50_s1, %s85_s24  ;;  %p91_p10 = scmp.lt.s32.totalorder %s85_s24, %s85_s24 }
  0x18   :  { %v36_v7 = vsub.s32 %v33_v5, %v35_v6  ;;  %p92_p11 = por %p91_p10, %p90_p9 }
  0x1a   :  { %p93_p12 = pnand %p92_p11, %p86_p8 }
  0x93   :  { %v30_v8 = vpop.permute.xlu0 %29 }
  0x94   :  { %v37_v11 = vrot.slane %v30_v8, %v36_v7 }
  0x96   :  { %v39_v12 = vmul.f32 %v37_v11, %v24_v9  ;;  %v40_v13 = vmul.f32 %v37_v11, %v25_v10 }
  0x98   :  { %41 = vst [vmem:[#allocation5] sm:$0xff] %v39_v12  ;;  %42 = vst [vmem:[#allocation5 + $0x8] sm:$0xff] %v40_v13 }
  0x99   :  { %96 = shalt.err (!%p93_p12)
}
  0x9a   :  { %s97_s26 = scalar_lea.hbm %s159_s2, 256 }
  0x9b   :  { %p98_p13 = scmp.ne.s32.totalorder %s159_s2, %s97_s26  ;;  %p101_p0 = scmp.lt.u32.totalorder %s97_s26, %s159_s2 }
  0x9d   :  { %p103_p1 = pnand %p101_p0, %p98_p13 }
  0x9f   :  { %106 = shalt.err (!%p103_p1)
}
  0xa0   :  { %52 = dma.vmem_to_hbm [thread:$0]  %s50_s1, 256, %s159_s2, [#allocation4]  }
  0xa1   :  { %109 = dma.done.wait [#allocation4], 256  }
  0xa2   :  { %110 = vsyncadd [#allocation4], 4294967040 }
  0xa3   :  { %56 = vsyncpa [#allocation3], 1 }
  0xa4   :  { %57 = vsyncpa [#allocation4], 1 }

</bundles_post_ra>
